<compile_context>
chip_gen: v7x
topology: tpu7x:2x2x1
jax: 0.10.0
libtpu: 0.0.40
codegen_flags: <defaults>
</compile_context>

<pallas_src>
import functools
import math

import jax
import jax.numpy as jnp
import numpy as np
from jax import lax
from jax.experimental import pallas as pl
from jax.experimental.pallas import tpu as pltpu

LN_EPS = 1e-5  # PyTorch nn.LayerNorm default


def _round_down(x, m):
    return (x // m) * m


def _vmem_capacity_bytes():
    try:
        return int(pltpu.get_tpu_info().vmem_capacity_bytes)
    except Exception:
        return 64 * 1024 * 1024  # conservative fallback (v7x per-TC VMEM)


# ---------------------------------------------------------------------------
# Fused path: one kernel, x streamed from HBM once, all folded weights resident.
# ---------------------------------------------------------------------------
def _choose_tg(G, L, C, N, merge_sizes, itemsize, budget):
    """Group-tile size for the fused kernel; 0 means 'does not fit, fall back'."""
    sum_r = sum(L // ms for ms in merge_sizes)
    # Folded bf16 weights + f32 biases, counted at 2 pipeline buffers each.
    w_resident = 2 * (sum(ms * C for ms in merge_sizes) * N * 2
                      + len(merge_sizes) * N * 4)
    avail = budget - w_resident
    if avail <= 0:
        return 0
    per_group = (2 * L * C * itemsize        # x tile (double-buffered)
                 + 3 * L * C * 4             # LN f32 temporaries (chunk live ranges)
                 + 2 * sum_r * N * itemsize  # output tiles (double-buffered)
                 + sum_r * N * 4)            # f32 matmul accumulators
    tg = avail // per_group
    tg = min(tg, max(8, (512 * min(merge_sizes)) // L))  # <=512-row matmuls
    tg = min(tg, max(8, _round_down(G // 4, 8)))         # keep >=~4 grid steps
    if tg >= G:
        return int(G)
    if tg < 8:
        return 0
    return int(_round_down(tg, 8))


def _fused_call(x2d, weights, biases, merge_sizes, *, L, C, N, tg, vmem_limit):
    """x2d: (G, L*C).  Returns one (G, (L//ms)*N) output per merge size."""
    G, LC = x2d.shape
    n = len(merge_sizes)
    out_dtype = x2d.dtype
    # TODO(synk): optionally emit bf16 outputs to halve write traffic when the
    # downstream consumer tolerates it.

    def kernel(x_ref, *refs):
        w_refs = refs[:n]
        b_refs = refs[n:2 * n]
        o_refs = refs[2 * n:]
        for idx, ms in enumerate(merge_sizes):
            k = ms * C
            w = w_refs[idx][...]
            b = b_refs[idx][...]
            for r in range(L // ms):
                xm = x_ref[:, r * k:(r + 1) * k].astype(jnp.float32)
                mean = jnp.mean(xm, axis=-1, keepdims=True)
                xc = xm - mean
                var = jnp.mean(xc * xc, axis=-1, keepdims=True)
                xn = xc * lax.rsqrt(var + LN_EPS)
                acc = jnp.dot(xn.astype(jnp.bfloat16), w,
                              preferred_element_type=jnp.float32)
                o_refs[idx][:, r * N:(r + 1) * N] = (acc + b).astype(o_refs[idx].dtype)

    in_specs = [pl.BlockSpec((tg, LC), lambda i: (i, 0))]          # streamed x tiles
    in_specs += [pl.BlockSpec((ms * C, N), lambda i: (0, 0))       # weights: resident
                 for ms in merge_sizes]
    in_specs += [pl.BlockSpec((1, N), lambda i: (0, 0))            # biases: resident
                 for _ in merge_sizes]
    out_shape = tuple(jax.ShapeDtypeStruct((G, (L // ms) * N), out_dtype)
                      for ms in merge_sizes)
    out_specs = tuple(pl.BlockSpec((tg, (L // ms) * N), lambda i: (i, 0))
                      for ms in merge_sizes)

    flops = sum(2 * G * (L // ms) * (ms * C) * N for ms in merge_sizes)
    transcendentals = sum(G * (L // ms) for ms in merge_sizes)
    bytes_accessed = (G * LC * x2d.dtype.itemsize
                      + sum(ms * C * N * 2 + N * 4 for ms in merge_sizes)
                      + sum(G * (L // ms) * N * out_dtype.itemsize
                            for ms in merge_sizes))

    return pl.pallas_call(
        kernel,
        out_shape=out_shape,
        grid=(pl.cdiv(G, tg),),
        in_specs=in_specs,
        out_specs=out_specs,
        compiler_params=pltpu.CompilerParams(
            dimension_semantics=("parallel",),
            vmem_limit_bytes=int(vmem_limit)),
        cost_estimate=pl.CostEstimate(flops=int(flops),
                                      transcendentals=int(transcendentals),
                                      bytes_accessed=int(bytes_accessed)),
    )(x2d, *weights, *biases)


# ---------------------------------------------------------------------------
# Branch path: per merge size, N-tiled resident weight slab (large ms*C / v7x).
# ---------------------------------------------------------------------------
def _choose_branch_tiles(M, K, N, itemsize, budget):
    tn = N
    if 2 * K * N * 2 > 0.35 * budget and N > 128:
        # N-tile the weight so the resident slab stays bounded on 64 MiB VMEM.
        cols = max(128, int(0.35 * budget) // (2 * K * 2))
        tn = _round_down(cols, 128)
        if tn >= 256:
            tn = _round_down(tn, 256)      # full 256-wide MXU tiles on v6e/v7x
        tn = min(tn, _round_down(N, 128))
    w_resident = 2 * (K * tn * 2 + tn * 4)
    avail = budget - w_resident
    per_row = (2 * K * itemsize            # x tile (double-buffered)
               + K * 2                     # normalized-x bf16 scratch
               + 3 * K * 4                 # LN f32 temporaries
               + 2 * tn * itemsize         # out tile (double-buffered)
               + tn * 4)                   # f32 accumulator
    tm = avail // per_row if avail > 0 else 0
    tm = min(tm, 512, max(8, _round_down(M // 4, 8)))
    if tm >= M:
        tm = M
    elif tm >= 8:
        tm = _round_down(tm, 8)
    else:
        raise ValueError(
            "PatchMerging: resident weight slab leaves no room for a row tile "
            f"(K={K}, N={N}, tn={tn}, VMEM budget={budget}B); reduce "
            "merge_size*dim or raise the VMEM limit.")
    return int(tm), int(tn)


def _branch_call(x2d, w_fold, b_fold, *, vmem_limit, budget):
    M, K = x2d.shape
    _, N = w_fold.shape
    out_dtype = x2d.dtype
    tm, tn = _choose_branch_tiles(M, K, N, x2d.dtype.itemsize, budget)

    def kernel(x_ref, w_ref, b_ref, o_ref, xn_ref):
        # LayerNorm once per row tile (first N tile only); reused across N tiles.
        @pl.when(pl.program_id(1) == 0)
        def _():
            x = x_ref[...].astype(jnp.float32)
            mean = jnp.mean(x, axis=-1, keepdims=True)
            xc = x - mean
            var = jnp.mean(xc * xc, axis=-1, keepdims=True)
            xn_ref[...] = (xc * lax.rsqrt(var + LN_EPS)).astype(jnp.bfloat16)

        acc = jnp.dot(xn_ref[...], w_ref[...], preferred_element_type=jnp.float32)
        o_ref[...] = (acc + b_ref[...]).astype(o_ref.dtype)

    return pl.pallas_call(
        kernel,
        out_shape=jax.ShapeDtypeStruct((M, N), out_dtype),
        grid=(pl.cdiv(M, tm), pl.cdiv(N, tn)),
        in_specs=[
            pl.BlockSpec((tm, K), lambda i, j: (i, 0)),   # x reused across N tiles
            pl.BlockSpec((K, tn), lambda i, j: (0, j)),   # N-tiled weight slab
            pl.BlockSpec((1, tn), lambda i, j: (0, j)),
        ],
        out_specs=pl.BlockSpec((tm, tn), lambda i, j: (i, j)),
        scratch_shapes=[pltpu.VMEM((tm, K), jnp.bfloat16)],
        compiler_params=pltpu.CompilerParams(
            dimension_semantics=("parallel", "arbitrary"),
            vmem_limit_bytes=int(vmem_limit)),
        cost_estimate=pl.CostEstimate(
            flops=int(2 * M * K * N), transcendentals=int(M),
            bytes_accessed=int(M * K * x2d.dtype.itemsize + K * N * 2 + N * 4
                               + M * N * out_dtype.itemsize)),
    )(x2d, w_fold, b_fold)


# ---------------------------------------------------------------------------
# Forward wrapper.
# ---------------------------------------------------------------------------
def patch_merging_forward(x, params, merge_sizes, force_path=None):
    """x: (B, F, C) -> (B, sum_i F//ms_i, 2*C). force_path in {None,'fused','branch'}."""
    B, F, C = x.shape
    N = 2 * C
    vmem_limit = int(_vmem_capacity_bytes() * 0.7)   # headroom for Mosaic scratch
    budget = int(vmem_limit * 0.85)                  # planning budget for tiles

    # Fold the LayerNorm affine into the linear layer (once per call, outside
    # the kernel): ((x-mu)*rs*gamma + beta) @ W == ((x-mu)*rs) @ (gamma*W) + beta@W
    weights, biases = [], []
    for i, ms in enumerate(merge_sizes):
        assert F % ms == 0, f"F={F} must be divisible by merge_size={ms}"
        gamma, beta, w = params[i]
        K = ms * C
        w_f32 = w.astype(jnp.float32)
        weights.append((gamma.reshape(K, 1).astype(jnp.float32) * w_f32)
                       .astype(jnp.bfloat16))                       # bf16 MXU operand
        biases.append(beta.reshape(1, K).astype(jnp.float32) @ w_f32)  # (1, N) f32

    L = math.lcm(*merge_sizes)
    assert (B * F) % L == 0
    G = B * F // L            # every merge size divides F => lcm divides F

    path = force_path
    tg = 0
    if path in (None, "fused"):
        tg = _choose_tg(G, L, C, N, merge_sizes, x.dtype.itemsize, budget)
        if tg == 0:
            if path == "fused":
                raise ValueError("Fused PatchMerging weights do not fit the VMEM "
                                 "budget; use force_path='branch'.")
            path = "branch"
        else:
            path = "fused"

    if path == "fused":
        outs = _fused_call(x.reshape(G, L * C), weights, biases, merge_sizes,
                           L=L, C=C, N=N, tg=tg, vmem_limit=vmem_limit)
        return jnp.concatenate(
            [o.reshape(B, F // ms, N) for o, ms in zip(outs, merge_sizes)], axis=1)

    outs = []
    for ms, w_fold, b_fold in zip(merge_sizes, weights, biases):
        M = B * (F // ms)
        y = _branch_call(x.reshape(M, ms * C), w_fold, b_fold,
                         vmem_limit=vmem_limit, budget=budget)
        outs.append(y.reshape(B, F // ms, N))
    return jnp.concatenate(outs, axis=1)


def patch_merging_reference(x, params, merge_sizes):
    """Pure-JAX f32 reference mirroring the PyTorch forward."""
    B, F, C = x.shape
    outs = []
    for i, ms in enumerate(merge_sizes):
        gamma, beta, w = params[i]
        xm = x.reshape(B, F // ms, ms * C).astype(jnp.float32)
        mean = jnp.mean(xm, axis=-1, keepdims=True)
        var = jnp.mean((xm - mean) ** 2, axis=-1, keepdims=True)
        xn = (xm - mean) / jnp.sqrt(var + LN_EPS)
        xn = xn * gamma.reshape(-1) + beta.reshape(-1)
        outs.append(jnp.einsum("bfk,kn->bfn", xn, w.astype(jnp.float32)))
    return jnp.concatenate(outs, axis=1).astype(x.dtype)


def init_params(key, dim, merge_sizes):
    params = []
    for ms in merge_sizes:
        key, k_g, k_b, k_w = jax.random.split(key, 4)
        K = ms * dim
        N = 2 * dim
        gamma = 1.0 + 0.1 * jax.random.normal(k_g, (1, K), dtype=jnp.float32)
        beta = 0.1 * jax.random.normal(k_b, (1, K), dtype=jnp.float32)
        bound = 1.0 / np.sqrt(K)
        w = jax.random.uniform(k_w, (K, N), dtype=jnp.float32,
                               minval=-bound, maxval=bound)
        params.append((gamma, beta, w))
    return params


if __name__ == "__main__":
    merge_sizes = [4, 8, 16]
    B, F, dim = 2, 16, 8   # F divisible by every merge size

    key = jax.random.PRNGKey(0)
    kx, kp = jax.random.split(key)
    x = jax.random.normal(kx, (B, F, dim), dtype=jnp.float32)
    params = init_params(kp, dim, merge_sizes)

    ref = patch_merging_reference(x, params, merge_sizes)
    expected_shape = (B, F // 4 + F // 8 + F // 16, 2 * dim)

    # Default (fused, single HBM read of x) path.
    fwd = jax.jit(functools.partial(patch_merging_forward, merge_sizes=merge_sizes))
    out = jax.block_until_ready(fwd(x, params))
    assert out.shape == expected_shape, out.shape
    # Loose tolerance: bf16 MXU operands with f32 accumulation and a folded
    # (gamma/beta -> W/b) formulation vs a pure-f32 reference.
    np.testing.assert_allclose(np.asarray(out), np.asarray(ref), rtol=2e-2, atol=2e-2)

    # Large-weight fallback path (N-tiled resident weights).  Exercised here so
    # it stays compile- and correctness-tested even though these small shapes
    # would normally pick the fused path.
    fwd_b = jax.jit(functools.partial(patch_merging_forward,
                                      merge_sizes=merge_sizes, force_path="branch"))
    out_b = jax.block_until_ready(fwd_b(x, params))
    assert out_b.shape == expected_shape, out_b.shape
    np.testing.assert_allclose(np.asarray(out_b), np.asarray(ref), rtol=2e-2, atol=2e-2)

    print("KERNEL_OK")
</pallas_src>

<mosaic_0001>
module attributes {stable_mosaic.version = 11 : i64} {
  func.func @kernel(%arg0: i32, %arg1: memref<2x128xf32, #tpu.memory_space<vmem>>, %arg2: memref<32x16xbf16, #tpu.memory_space<vmem>>, %arg3: memref<64x16xbf16, #tpu.memory_space<vmem>>, %arg4: memref<128x16xbf16, #tpu.memory_space<vmem>>, %arg5: memref<1x16xf32, #tpu.memory_space<vmem>>, %arg6: memref<1x16xf32, #tpu.memory_space<vmem>>, %arg7: memref<1x16xf32, #tpu.memory_space<vmem>>, %arg8: memref<2x64xf32, #tpu.memory_space<vmem>>, %arg9: memref<2x32xf32, #tpu.memory_space<vmem>>, %arg10: memref<2x16xf32, #tpu.memory_space<vmem>>) attributes {dimension_semantics = [#tpu.dimension_semantics<parallel>], iteration_bounds = array<i64: 1>, scalar_prefetch = 0 : i64, scratch_operands = 0 : i64, tpu.core_type = #tpu.core_type<tc>, window_params = [{transform_indices = @transform_0, window_bounds = array<i64: 2, 128>}, {pipeline_mode = #tpu.pipeline_mode<synchronous>, transform_indices = @transform_1, window_bounds = array<i64: 32, 16>}, {pipeline_mode = #tpu.pipeline_mode<synchronous>, transform_indices = @transform_2, window_bounds = array<i64: 64, 16>}, {pipeline_mode = #tpu.pipeline_mode<synchronous>, transform_indices = @transform_3, window_bounds = array<i64: 128, 16>}, {pipeline_mode = #tpu.pipeline_mode<synchronous>, transform_indices = @transform_4, window_bounds = array<i64: 1, 16>}, {pipeline_mode = #tpu.pipeline_mode<synchronous>, transform_indices = @transform_5, window_bounds = array<i64: 1, 16>}, {pipeline_mode = #tpu.pipeline_mode<synchronous>, transform_indices = @transform_6, window_bounds = array<i64: 1, 16>}, {transform_indices = @transform_7, window_bounds = array<i64: 2, 64>}, {transform_indices = @transform_8, window_bounds = array<i64: 2, 32>}, {transform_indices = @transform_9, window_bounds = array<i64: 2, 16>}]} {
    %c0 = arith.constant 0 : index
    %c0_0 = arith.constant 0 : index
    %0 = vector.load %arg2[%c0, %c0_0] : memref<32x16xbf16, #tpu.memory_space<vmem>>, vector<32x16xbf16>
    %c0_1 = arith.constant 0 : index
    %c0_2 = arith.constant 0 : index
    %1 = vector.load %arg5[%c0_1, %c0_2] : memref<1x16xf32, #tpu.memory_space<vmem>>, vector<1x16xf32>
    %c0_3 = arith.constant 0 : index
    %c0_4 = arith.constant 0 : index
    %2 = vector.load %arg1[%c0_3, %c0_4] : memref<2x128xf32, #tpu.memory_space<vmem>>, vector<2x32xf32>
    %cst = arith.constant dense<0.000000e+00> : vector<2xf32>
    %3 = vector.multi_reduction <add>, %2, %cst [1] : vector<2x32xf32> to vector<2xf32>
    %4 = vector.shape_cast %3 : vector<2xf32> to vector<2x1xf32>
    %cst_5 = arith.constant 3.200000e+01 : f32
    %5 = vector.broadcast %cst_5 : f32 to vector<2x1xf32>
    %6 = arith.divf %4, %5 : vector<2x1xf32>
    %7 = vector.broadcast %6 : vector<2x1xf32> to vector<2x32xf32>
    %8 = arith.subf %2, %7 : vector<2x32xf32>
    %9 = arith.mulf %8, %8 : vector<2x32xf32>
    %cst_6 = arith.constant dense<0.000000e+00> : vector<2xf32>
    %10 = vector.multi_reduction <add>, %9, %cst_6 [1] : vector<2x32xf32> to vector<2xf32>
    %11 = vector.shape_cast %10 : vector<2xf32> to vector<2x1xf32>
    %cst_7 = arith.constant 3.200000e+01 : f32
    %12 = vector.broadcast %cst_7 : f32 to vector<2x1xf32>
    %13 = arith.divf %11, %12 : vector<2x1xf32>
    %cst_8 = arith.constant 9.99999974E-6 : f32
    %14 = vector.broadcast %cst_8 : f32 to vector<2x1xf32>
    %15 = arith.addf %13, %14 : vector<2x1xf32>
    %16 = math.rsqrt %15 : vector<2x1xf32>
    %17 = vector.broadcast %16 : vector<2x1xf32> to vector<2x32xf32>
    %18 = arith.mulf %8, %17 : vector<2x32xf32>
    %19 = arith.truncf %18 : vector<2x32xf32> to vector<2x32xbf16>
    %cst_9 = arith.constant dense<0.000000e+00> : vector<2x16xf32>
    %20 = tpu.matmul %19, %0, %cst_9 {dimension_numbers = #tpu.dot_dimension_numbers<[1], [0], [0], [1], [0, 0, 1, 1], [], []>} : vector<2x32xbf16>, vector<32x16xbf16>, vector<2x16xf32> -> vector<2x16xf32>
    %21 = vector.broadcast %1 : vector<1x16xf32> to vector<2x16xf32>
    %22 = arith.addf %20, %21 : vector<2x16xf32>
    %c0_10 = arith.constant 0 : index
    %c0_11 = arith.constant 0 : index
    %23 = vector.load %arg8[%c0_10, %c0_11] : memref<2x64xf32, #tpu.memory_space<vmem>>, vector<2x16xf32>
    tpu.vector_store %arg8[%c0_10, %c0_11], %22 {strides = array<i32>} : memref<2x64xf32, #tpu.memory_space<vmem>>, vector<2x16xf32>,
    %c0_12 = arith.constant 0 : index
    %c32 = arith.constant 32 : index
    %24 = vector.load %arg1[%c0_12, %c32] : memref<2x128xf32, #tpu.memory_space<vmem>>, vector<2x32xf32>
    %cst_13 = arith.constant dense<0.000000e+00> : vector<2xf32>
    %25 = vector.multi_reduction <add>, %24, %cst_13 [1] : vector<2x32xf32> to vector<2xf32>
    %26 = vector.shape_cast %25 : vector<2xf32> to vector<2x1xf32>
    %cst_14 = arith.constant 3.200000e+01 : f32
    %27 = vector.broadcast %cst_14 : f32 to vector<2x1xf32>
    %28 = arith.divf %26, %27 : vector<2x1xf32>
    %29 = vector.broadcast %28 : vector<2x1xf32> to vector<2x32xf32>
    %30 = arith.subf %24, %29 : vector<2x32xf32>
    %31 = arith.mulf %30, %30 : vector<2x32xf32>
    %cst_15 = arith.constant dense<0.000000e+00> : vector<2xf32>
    %32 = vector.multi_reduction <add>, %31, %cst_15 [1] : vector<2x32xf32> to vector<2xf32>
    %33 = vector.shape_cast %32 : vector<2xf32> to vector<2x1xf32>
    %cst_16 = arith.constant 3.200000e+01 : f32
    %34 = vector.broadcast %cst_16 : f32 to vector<2x1xf32>
    %35 = arith.divf %33, %34 : vector<2x1xf32>
    %cst_17 = arith.constant 9.99999974E-6 : f32
    %36 = vector.broadcast %cst_17 : f32 to vector<2x1xf32>
    %37 = arith.addf %35, %36 : vector<2x1xf32>
    %38 = math.rsqrt %37 : vector<2x1xf32>
    %39 = vector.broadcast %38 : vector<2x1xf32> to vector<2x32xf32>
    %40 = arith.mulf %30, %39 : vector<2x32xf32>
    %41 = arith.truncf %40 : vector<2x32xf32> to vector<2x32xbf16>
    %cst_18 = arith.constant dense<0.000000e+00> : vector<2x16xf32>
    %42 = tpu.matmul %41, %0, %cst_18 {dimension_numbers = #tpu.dot_dimension_numbers<[1], [0], [0], [1], [0, 0, 1, 1], [], []>} : vector<2x32xbf16>, vector<32x16xbf16>, vector<2x16xf32> -> vector<2x16xf32>
    %43 = vector.broadcast %1 : vector<1x16xf32> to vector<2x16xf32>
    %44 = arith.addf %42, %43 : vector<2x16xf32>
    %c0_19 = arith.constant 0 : index
    %c16 = arith.constant 16 : index
    %45 = vector.load %arg8[%c0_19, %c16] : memref<2x64xf32, #tpu.memory_space<vmem>>, vector<2x16xf32>
    tpu.vector_store %arg8[%c0_19, %c16], %44 {strides = array<i32>} : memref<2x64xf32, #tpu.memory_space<vmem>>, vector<2x16xf32>,
    %c0_20 = arith.constant 0 : index
    %c64 = arith.constant 64 : index
    %46 = vector.load %arg1[%c0_20, %c64] : memref<2x128xf32, #tpu.memory_space<vmem>>, vector<2x32xf32>
    %cst_21 = arith.constant dense<0.000000e+00> : vector<2xf32>
    %47 = vector.multi_reduction <add>, %46, %cst_21 [1] : vector<2x32xf32> to vector<2xf32>
    %48 = vector.shape_cast %47 : vector<2xf32> to vector<2x1xf32>
    %cst_22 = arith.constant 3.200000e+01 : f32
    %49 = vector.broadcast %cst_22 : f32 to vector<2x1xf32>
    %50 = arith.divf %48, %49 : vector<2x1xf32>
    %51 = vector.broadcast %50 : vector<2x1xf32> to vector<2x32xf32>
    %52 = arith.subf %46, %51 : vector<2x32xf32>
    %53 = arith.mulf %52, %52 : vector<2x32xf32>
    %cst_23 = arith.constant dense<0.000000e+00> : vector<2xf32>
    %54 = vector.multi_reduction <add>, %53, %cst_23 [1] : vector<2x32xf32> to vector<2xf32>
    %55 = vector.shape_cast %54 : vector<2xf32> to vector<2x1xf32>
    %cst_24 = arith.constant 3.200000e+01 : f32
    %56 = vector.broadcast %cst_24 : f32 to vector<2x1xf32>
    %57 = arith.divf %55, %56 : vector<2x1xf32>
    %cst_25 = arith.constant 9.99999974E-6 : f32
    %58 = vector.broadcast %cst_25 : f32 to vector<2x1xf32>
    %59 = arith.addf %57, %58 : vector<2x1xf32>
    %60 = math.rsqrt %59 : vector<2x1xf32>
    %61 = vector.broadcast %60 : vector<2x1xf32> to vector<2x32xf32>
    %62 = arith.mulf %52, %61 : vector<2x32xf32>
    %63 = arith.truncf %62 : vector<2x32xf32> to vector<2x32xbf16>
    %cst_26 = arith.constant dense<0.000000e+00> : vector<2x16xf32>
    %64 = tpu.matmul %63, %0, %cst_26 {dimension_numbers = #tpu.dot_dimension_numbers<[1], [0], [0], [1], [0, 0, 1, 1], [], []>} : vector<2x32xbf16>, vector<32x16xbf16>, vector<2x16xf32> -> vector<2x16xf32>
    %65 = vector.broadcast %1 : vector<1x16xf32> to vector<2x16xf32>
    %66 = arith.addf %64, %65 : vector<2x16xf32>
    %c0_27 = arith.constant 0 : index
    %c32_28 = arith.constant 32 : index
    %67 = vector.load %arg8[%c0_27, %c32_28] : memref<2x64xf32, #tpu.memory_space<vmem>>, vector<2x16xf32>
    tpu.vector_store %arg8[%c0_27, %c32_28], %66 {strides = array<i32>} : memref<2x64xf32, #tpu.memory_space<vmem>>, vector<2x16xf32>,
    %c0_29 = arith.constant 0 : index
    %c96 = arith.constant 96 : index
    %68 = vector.load %arg1[%c0_29, %c96] : memref<2x128xf32, #tpu.memory_space<vmem>>, vector<2x32xf32>
    %cst_30 = arith.constant dense<0.000000e+00> : vector<2xf32>
    %69 = vector.multi_reduction <add>, %68, %cst_30 [1] : vector<2x32xf32> to vector<2xf32>
    %70 = vector.shape_cast %69 : vector<2xf32> to vector<2x1xf32>
    %cst_31 = arith.constant 3.200000e+01 : f32
    %71 = vector.broadcast %cst_31 : f32 to vector<2x1xf32>
    %72 = arith.divf %70, %71 : vector<2x1xf32>
    %73 = vector.broadcast %72 : vector<2x1xf32> to vector<2x32xf32>
    %74 = arith.subf %68, %73 : vector<2x32xf32>
    %75 = arith.mulf %74, %74 : vector<2x32xf32>
    %cst_32 = arith.constant dense<0.000000e+00> : vector<2xf32>
    %76 = vector.multi_reduction <add>, %75, %cst_32 [1] : vector<2x32xf32> to vector<2xf32>
    %77 = vector.shape_cast %76 : vector<2xf32> to vector<2x1xf32>
    %cst_33 = arith.constant 3.200000e+01 : f32
    %78 = vector.broadcast %cst_33 : f32 to vector<2x1xf32>
    %79 = arith.divf %77, %78 : vector<2x1xf32>
    %cst_34 = arith.constant 9.99999974E-6 : f32
    %80 = vector.broadcast %cst_34 : f32 to vector<2x1xf32>
    %81 = arith.addf %79, %80 : vector<2x1xf32>
    %82 = math.rsqrt %81 : vector<2x1xf32>
    %83 = vector.broadcast %82 : vector<2x1xf32> to vector<2x32xf32>
    %84 = arith.mulf %74, %83 : vector<2x32xf32>
    %85 = arith.truncf %84 : vector<2x32xf32> to vector<2x32xbf16>
    %cst_35 = arith.constant dense<0.000000e+00> : vector<2x16xf32>
    %86 = tpu.matmul %85, %0, %cst_35 {dimension_numbers = #tpu.dot_dimension_numbers<[1], [0], [0], [1], [0, 0, 1, 1], [], []>} : vector<2x32xbf16>, vector<32x16xbf16>, vector<2x16xf32> -> vector<2x16xf32>
    %87 = vector.broadcast %1 : vector<1x16xf32> to vector<2x16xf32>
    %88 = arith.addf %86, %87 : vector<2x16xf32>
    %c0_36 = arith.constant 0 : index
    %c48 = arith.constant 48 : index
    %89 = vector.load %arg8[%c0_36, %c48] : memref<2x64xf32, #tpu.memory_space<vmem>>, vector<2x16xf32>
    tpu.vector_store %arg8[%c0_36, %c48], %88 {strides = array<i32>} : memref<2x64xf32, #tpu.memory_space<vmem>>, vector<2x16xf32>,
    %c0_37 = arith.constant 0 : index
    %c0_38 = arith.constant 0 : index
    %90 = vector.load %arg3[%c0_37, %c0_38] : memref<64x16xbf16, #tpu.memory_space<vmem>>, vector<64x16xbf16>
    %c0_39 = arith.constant 0 : index
    %c0_40 = arith.constant 0 : index
    %91 = vector.load %arg6[%c0_39, %c0_40] : memref<1x16xf32, #tpu.memory_space<vmem>>, vector<1x16xf32>
    %c0_41 = arith.constant 0 : index
    %c0_42 = arith.constant 0 : index
    %92 = vector.load %arg1[%c0_41, %c0_42] : memref<2x128xf32, #tpu.memory_space<vmem>>, vector<2x64xf32>
    %cst_43 = arith.constant dense<0.000000e+00> : vector<2xf32>
    %93 = vector.multi_reduction <add>, %92, %cst_43 [1] : vector<2x64xf32> to vector<2xf32>
    %94 = vector.shape_cast %93 : vector<2xf32> to vector<2x1xf32>
    %cst_44 = arith.constant 6.400000e+01 : f32
    %95 = vector.broadcast %cst_44 : f32 to vector<2x1xf32>
    %96 = arith.divf %94, %95 : vector<2x1xf32>
    %97 = vector.broadcast %96 : vector<2x1xf32> to vector<2x64xf32>
    %98 = arith.subf %92, %97 : vector<2x64xf32>
    %99 = arith.mulf %98, %98 : vector<2x64xf32>
    %cst_45 = arith.constant dense<0.000000e+00> : vector<2xf32>
    %100 = vector.multi_reduction <add>, %99, %cst_45 [1] : vector<2x64xf32> to vector<2xf32>
    %101 = vector.shape_cast %100 : vector<2xf32> to vector<2x1xf32>
    %cst_46 = arith.constant 6.400000e+01 : f32
    %102 = vector.broadcast %cst_46 : f32 to vector<2x1xf32>
    %103 = arith.divf %101, %102 : vector<2x1xf32>
    %cst_47 = arith.constant 9.99999974E-6 : f32
    %104 = vector.broadcast %cst_47 : f32 to vector<2x1xf32>
    %105 = arith.addf %103, %104 : vector<2x1xf32>
    %106 = math.rsqrt %105 : vector<2x1xf32>
    %107 = vector.broadcast %106 : vector<2x1xf32> to vector<2x64xf32>
    %108 = arith.mulf %98, %107 : vector<2x64xf32>
    %109 = arith.truncf %108 : vector<2x64xf32> to vector<2x64xbf16>
    %cst_48 = arith.constant dense<0.000000e+00> : vector<2x16xf32>
    %110 = tpu.matmul %109, %90, %cst_48 {dimension_numbers = #tpu.dot_dimension_numbers<[1], [0], [0], [1], [0, 0, 1, 1], [], []>} : vector<2x64xbf16>, vector<64x16xbf16>, vector<2x16xf32> -> vector<2x16xf32>
    %111 = vector.broadcast %91 : vector<1x16xf32> to vector<2x16xf32>
    %112 = arith.addf %110, %111 : vector<2x16xf32>
    %c0_49 = arith.constant 0 : index
    %c0_50 = arith.constant 0 : index
    %113 = vector.load %arg9[%c0_49, %c0_50] : memref<2x32xf32, #tpu.memory_space<vmem>>, vector<2x16xf32>
    tpu.vector_store %arg9[%c0_49, %c0_50], %112 {strides = array<i32>} : memref<2x32xf32, #tpu.memory_space<vmem>>, vector<2x16xf32>,
    %c0_51 = arith.constant 0 : index
    %c64_52 = arith.constant 64 : index
    %114 = vector.load %arg1[%c0_51, %c64_52] : memref<2x128xf32, #tpu.memory_space<vmem>>, vector<2x64xf32>
    %cst_53 = arith.constant dense<0.000000e+00> : vector<2xf32>
    %115 = vector.multi_reduction <add>, %114, %cst_53 [1] : vector<2x64xf32> to vector<2xf32>
    %116 = vector.shape_cast %115 : vector<2xf32> to vector<2x1xf32>
    %cst_54 = arith.constant 6.400000e+01 : f32
    %117 = vector.broadcast %cst_54 : f32 to vector<2x1xf32>
    %118 = arith.divf %116, %117 : vector<2x1xf32>
    %119 = vector.broadcast %118 : vector<2x1xf32> to vector<2x64xf32>
    %120 = arith.subf %114, %119 : vector<2x64xf32>
    %121 = arith.mulf %120, %120 : vector<2x64xf32>
    %cst_55 = arith.constant dense<0.000000e+00> : vector<2xf32>
    %122 = vector.multi_reduction <add>, %121, %cst_55 [1] : vector<2x64xf32> to vector<2xf32>
    %123 = vector.shape_cast %122 : vector<2xf32> to vector<2x1xf32>
    %cst_56 = arith.constant 6.400000e+01 : f32
    %124 = vector.broadcast %cst_56 : f32 to vector<2x1xf32>
    %125 = arith.divf %123, %124 : vector<2x1xf32>
    %cst_57 = arith.constant 9.99999974E-6 : f32
    %126 = vector.broadcast %cst_57 : f32 to vector<2x1xf32>
    %127 = arith.addf %125, %126 : vector<2x1xf32>
    %128 = math.rsqrt %127 : vector<2x1xf32>
    %129 = vector.broadcast %128 : vector<2x1xf32> to vector<2x64xf32>
    %130 = arith.mulf %120, %129 : vector<2x64xf32>
    %131 = arith.truncf %130 : vector<2x64xf32> to vector<2x64xbf16>
    %cst_58 = arith.constant dense<0.000000e+00> : vector<2x16xf32>
    %132 = tpu.matmul %131, %90, %cst_58 {dimension_numbers = #tpu.dot_dimension_numbers<[1], [0], [0], [1], [0, 0, 1, 1], [], []>} : vector<2x64xbf16>, vector<64x16xbf16>, vector<2x16xf32> -> vector<2x16xf32>
    %133 = vector.broadcast %91 : vector<1x16xf32> to vector<2x16xf32>
    %134 = arith.addf %132, %133 : vector<2x16xf32>
    %c0_59 = arith.constant 0 : index
    %c16_60 = arith.constant 16 : index
    %135 = vector.load %arg9[%c0_59, %c16_60] : memref<2x32xf32, #tpu.memory_space<vmem>>, vector<2x16xf32>
    tpu.vector_store %arg9[%c0_59, %c16_60], %134 {strides = array<i32>} : memref<2x32xf32, #tpu.memory_space<vmem>>, vector<2x16xf32>,
    %c0_61 = arith.constant 0 : index
    %c0_62 = arith.constant 0 : index
    %136 = vector.load %arg4[%c0_61, %c0_62] : memref<128x16xbf16, #tpu.memory_space<vmem>>, vector<128x16xbf16>
    %c0_63 = arith.constant 0 : index
    %c0_64 = arith.constant 0 : index
    %137 = vector.load %arg7[%c0_63, %c0_64] : memref<1x16xf32, #tpu.memory_space<vmem>>, vector<1x16xf32>
    %c0_65 = arith.constant 0 : index
    %c0_66 = arith.constant 0 : index
    %138 = vector.load %arg1[%c0_65, %c0_66] : memref<2x128xf32, #tpu.memory_space<vmem>>, vector<2x128xf32>
    %cst_67 = arith.constant dense<0.000000e+00> : vector<2xf32>
    %139 = vector.multi_reduction <add>, %138, %cst_67 [1] : vector<2x128xf32> to vector<2xf32>
    %140 = vector.shape_cast %139 : vector<2xf32> to vector<2x1xf32>
    %cst_68 = arith.constant 1.280000e+02 : f32
    %141 = vector.broadcast %cst_68 : f32 to vector<2x1xf32>
    %142 = arith.divf %140, %141 : vector<2x1xf32>
    %143 = vector.broadcast %142 : vector<2x1xf32> to vector<2x128xf32>
    %144 = arith.subf %138, %143 : vector<2x128xf32>
    %145 = arith.mulf %144, %144 : vector<2x128xf32>
    %cst_69 = arith.constant dense<0.000000e+00> : vector<2xf32>
    %146 = vector.multi_reduction <add>, %145, %cst_69 [1] : vector<2x128xf32> to vector<2xf32>
    %147 = vector.shape_cast %146 : vector<2xf32> to vector<2x1xf32>
    %cst_70 = arith.constant 1.280000e+02 : f32
    %148 = vector.broadcast %cst_70 : f32 to vector<2x1xf32>
    %149 = arith.divf %147, %148 : vector<2x1xf32>
    %cst_71 = arith.constant 9.99999974E-6 : f32
    %150 = vector.broadcast %cst_71 : f32 to vector<2x1xf32>
    %151 = arith.addf %149, %150 : vector<2x1xf32>
    %152 = math.rsqrt %151 : vector<2x1xf32>
    %153 = vector.broadcast %152 : vector<2x1xf32> to vector<2x128xf32>
    %154 = arith.mulf %144, %153 : vector<2x128xf32>
    %155 = arith.truncf %154 : vector<2x128xf32> to vector<2x128xbf16>
    %cst_72 = arith.constant dense<0.000000e+00> : vector<2x16xf32>
    %156 = tpu.matmul %155, %136, %cst_72 {dimension_numbers = #tpu.dot_dimension_numbers<[1], [0], [0], [1], [0, 0, 1, 1], [], []>} : vector<2x128xbf16>, vector<128x16xbf16>, vector<2x16xf32> -> vector<2x16xf32>
    %157 = vector.broadcast %137 : vector<1x16xf32> to vector<2x16xf32>
    %158 = arith.addf %156, %157 : vector<2x16xf32>
    %c0_73 = arith.constant 0 : index
    %c0_74 = arith.constant 0 : index
    %159 = vector.load %arg10[%c0_73, %c0_74] : memref<2x16xf32, #tpu.memory_space<vmem>>, vector<2x16xf32>
    tpu.vector_store %arg10[%c0_73, %c0_74], %158 {strides = array<i32>} : memref<2x16xf32, #tpu.memory_space<vmem>>, vector<2x16xf32>,
    return
  }
  func.func @transform_0(%arg0: i32) -> (i32, i32) {
    %c0_i32 = arith.constant 0 : i32
    %c0_i32_0 = arith.constant 0 : i32
    return %arg0, %c0_i32 : i32, i32
  }
  func.func @transform_1(%arg0: i32) -> (i32, i32) {
    %c0_i32 = arith.constant 0 : i32
    %c0_i32_0 = arith.constant 0 : i32
    %c0_i32_1 = arith.constant 0 : i32
    return %c0_i32, %c0_i32_0 : i32, i32
  }
  func.func @transform_2(%arg0: i32) -> (i32, i32) {
    %c0_i32 = arith.constant 0 : i32
    %c0_i32_0 = arith.constant 0 : i32
    %c0_i32_1 = arith.constant 0 : i32
    return %c0_i32, %c0_i32_0 : i32, i32
  }
  func.func @transform_3(%arg0: i32) -> (i32, i32) {
    %c0_i32 = arith.constant 0 : i32
    %c0_i32_0 = arith.constant 0 : i32
    %c0_i32_1 = arith.constant 0 : i32
    return %c0_i32, %c0_i32_0 : i32, i32
  }
  func.func @transform_4(%arg0: i32) -> (i32, i32) {
    %c0_i32 = arith.constant 0 : i32
    %c0_i32_0 = arith.constant 0 : i32
    %c0_i32_1 = arith.constant 0 : i32
    return %c0_i32, %c0_i32_0 : i32, i32
  }
  func.func @transform_5(%arg0: i32) -> (i32, i32) {
    %c0_i32 = arith.constant 0 : i32
    %c0_i32_0 = arith.constant 0 : i32
    %c0_i32_1 = arith.constant 0 : i32
    return %c0_i32, %c0_i32_0 : i32, i32
  }
  func.func @transform_6(%arg0: i32) -> (i32, i32) {
    %c0_i32 = arith.constant 0 : i32
    %c0_i32_0 = arith.constant 0 : i32
    %c0_i32_1 = arith.constant 0 : i32
    return %c0_i32, %c0_i32_0 : i32, i32
  }
  func.func @transform_7(%arg0: i32) -> (i32, i32) {
    %c0_i32 = arith.constant 0 : i32
    %c0_i32_0 = arith.constant 0 : i32
    return %arg0, %c0_i32 : i32, i32
  }
  func.func @transform_8(%arg0: i32) -> (i32, i32) {
    %c0_i32 = arith.constant 0 : i32
    %c0_i32_0 = arith.constant 0 : i32
    return %arg0, %c0_i32 : i32, i32
  }
  func.func @transform_9(%arg0: i32) -> (i32, i32) {
    %c0_i32 = arith.constant 0 : i32
    %c0_i32_0 = arith.constant 0 : i32
    return %arg0, %c0_i32 : i32, i32
  }
}

</mosaic_0001>

<bundles_post_ra>
// kernel: patch_merging_forward.1
= control target key start
LH: loop header
LB: loop body
LE: loop exit
PB: predicated region body
PF: predicated region fallthrough
CT: control target
= control target key end

     0   :  { %s822_s13 = smov 96   ;;  %s823_s14 = smov 64   ;;  %vm36_vm0 = vcmask 254976   ;;  %vm351_vm1 = vcmask 517120   ;;  %vm534_vm2 = vcmask 1041408   ;;  %v825_v47 = vmov 0.0   ;;  %s1099_s0 = inlined_call_operand.vmem [shape: f32[2,128], index: 0, kind: input, shape index: {}]   ;;  %s1100_s1 = inlined_call_operand.vmem [shape: bf16[32,16], index: 1, kind: input, shape index: {}]   ;;  %s1101_s2 = inlined_call_operand.vmem [shape: bf16[64,16], index: 2, kind: input, shape index: {}]   ;;  %s1102_s3 = inlined_call_operand.vmem [shape: bf16[128,16], index: 3, kind: input, shape index: {}]   ;;  %s1103_s4 = inlined_call_operand.vmem [shape: f32[1,16], index: 4, kind: input, shape index: {}]   ;;  %s1104_s5 = inlined_call_operand.vmem [shape: f32[1,16], index: 5, kind: input, shape index: {}]   ;;  %s1105_s7 = inlined_call_operand.vmem [shape: f32[2,64], index: 7, kind: output, shape index: {0}]   ;;  %s1106_s8 = inlined_call_operand.vmem [shape: f32[2,32], index: 8, kind: output, shape index: {1}]   ;;  %s1107_s6 = inlined_call_operand.vmem [shape: f32[1,16], index: 6, kind: input, shape index: {}]   ;;  %s1108_s9 = inlined_call_operand.vmem [shape: f32[2,16], index: 9, kind: output, shape index: {2}]  }
   0x1   :  { %v116_v0 = vld [vmem:[%s1099_s0] sm:$0x3]  ;;  %s824_s19 = smov 32   ;;  %719 = vmatprep.subr.bf16.mxu1 %v825_v47  ;;  %vm826_vm3 = vmmov 0   ;;  %711 = vmatprep.subr.bf16.mxu0 %v825_v47  ;;  %v958_v49 = vld [vmem:[%s1100_s1 + $0x8] sm:$0xff]   ;;  %vm70_vm4 = vcmask 261120  }
   0x2   :  { %v191_v1 = vld [vmem:[%s1099_s0] sm:$0x3]  ;;  %118 = vrot.lane.b32.xlu0 %v116_v0, %s822_s13  ;;  %723 = vmatprep.mubr.msk.bf16.mxu1 %vm826_vm3, %v825_v47  ;;  %vm397_vm5 = vcmask 523264   ;;  %vm114_vm6 = vcmask 123904   ;;  %vm189_vm7 = vcmask 255104   ;;  %vm264_vm8 = vcmask 386304  }
   0x3   :  { %193 = vrot.lane.b32.xlu1 %v191_v1, %s823_s14  ;;  %v266_v2 = vld [vmem:[%s1099_s0] sm:$0x3]  ;;  %715 = vmatprep.mubr.msk.bf16.mxu0 %vm826_vm3, %v825_v47  ;;  %vm339_vm9 = vcmask 517504  }
   0x4   :  { %v442_v3 = vld [vmem:[%s1099_s0] sm:$0x3] }
   0x5   :  { %v350_v28 = vld [vmem:[%s1099_s0] sm:$0x3] }
   0x6   :  { %268 = vrot.lane.b32.xlu0 %v266_v2, %s824_s19  ;;  %v352_v29 = vsel %vm351_vm1, %v350_v28, 0.0  ;;  %v35_v34 = vld [vmem:[%s1099_s0] sm:$0x3] }
   0x7   :  { %444 = vrot.lane.b32.xlu1 %v442_v3, %s823_s14  ;;  %v930_v35 = vld [vmem:[%s1099_s0] sm:$0x3]  ;;  %v37_v38 = vsel %vm36_vm0, %v35_v34, 0.0 }
   0x8   :  { %v535_v39 = vsel %vm534_vm2, %v930_v35, 0.0  ;;  %v947_v48 = vld [vmem:[%s1100_s1] sm:$0xff]  }
   0x9   :  { %720 = vmatpush3.bf16.msra.mxu1 %v947_v48  ;;  %712 = vmatpush3.bf16.msra.mxu0 %v947_v48 }
   0xa   :  { %721 = vmatprep.subr.bf16.mxu1 %v825_v47  ;;  %713 = vmatprep.subr.bf16.mxu0 %v825_v47 }
   0xd   :  { %722 = vmatpush3.bf16.msra.mxu1 %v958_v49  ;;  %714 = vmatpush3.bf16.msra.mxu0 %v958_v49 }
   0xe   :  { %735 = vmatprep.subr.bf16.mxu1 %v825_v47  ;;  %727 = vmatprep.subr.bf16.mxu0 %v825_v47 }
  0x74   :  { %v119_v4 = vpop.permute.xlu0 %118 }
  0x75   :  { %v194_v5 = vpop.permute.xlu1 %193  ;;  %v121_v6 = vsel %vm36_vm0, %v119_v4, 0.0 }
  0x76   :  { %122 = vadd.xlane.f32.xlu0 %v121_v6  ;;  %v196_v7 = vsel %vm36_vm0, %v194_v5, 0.0 }
  0x78   :  { %v269_v8 = vpop.permute.xlu0 %268 }
  0x79   :  { %v445_v9 = vpop.permute.xlu1 %444  ;;  %v271_v10 = vsel %vm36_vm0, %v269_v8, 0.0 }
  0x7a   :  { %197 = vadd.xlane.f32.xlu0 %v196_v7  ;;  %272 = vadd.xlane.f32.xlu1 %v271_v10  ;;  %v447_v11 = vsel %vm351_vm1, %v445_v9, 0.0 }
  0x7e   :  { %448 = vadd.xlane.f32.xlu0 %v447_v11 }
 0x103   :  { %v123_v12 = vpop.xlane.xlu0 %122 }
 0x104   :  { %v124_v13 = vmul.f32 0.03125, %v123_v12 }
 0x106   :  { %v899_v14 = vsub.f32 %v116_v0, %v124_v13 }
 0x107   :  { %v273_v15 = vpop.xlane.xlu1 %272  ;;  %v198_v16 = vpop.xlane.xlu0 %197 }
 0x108   :  { %v274_v17 = vmul.f32 0.03125, %v273_v15  ;;  %v199_v18 = vmul.f32 0.03125, %v198_v16  ;;  %v126_v19 = vmul.f32 %v899_v14, %v899_v14 }
 0x10a   :  { %v903_v20 = vsub.f32 %v266_v2, %v274_v17  ;;  %v905_v21 = vsub.f32 %v191_v1, %v199_v18  ;;  %128 = vrot.lane.b32.xlu1 %v126_v19, %s822_s13 }
 0x10b   :  { %v449_v22 = vpop.xlane.xlu0 %448 }
 0x10c   :  { %v450_v23 = vmul.f32 0.015625, %v449_v22  ;;  %v276_v24 = vmul.f32 %v903_v20, %v903_v20  ;;  %v201_v25 = vmul.f32 %v905_v21, %v905_v21 }
 0x10e   :  { %v912_v26 = vsub.f32 %v442_v3, %v450_v23  ;;  %278 = vrot.lane.b32.xlu0 %v276_v24, %s824_s19  ;;  %203 = vrot.lane.b32.xlu1 %v201_v25, %s823_s14 }
 0x110   :  { %v452_v27 = vmul.f32 %v912_v26, %v912_v26 }
 0x112   :  { %454 = vrot.lane.b32.xlu1 %v452_v27, %s823_s14 }
 0x136   :  { %353 = vadd.xlane.f32.xlu1 %v352_v29  ;;  %v797_v29 = vld [vmem:[%s1101_s2 + $0x8] sm:$0xff]  }
 0x17c   :  { %v129_v30 = vpop.permute.xlu1 %128 }
 0x17d   :  { %v131_v31 = vsel %vm36_vm0, %v129_v30, 0.0  ;;  %v798_v30 = vld [vmem:[%s1101_s2 + $0x10] sm:$0xff]  }
 0x17e   :  { %132 = vadd.xlane.f32.xlu0 %v131_v31 }
 0x180   :  { %v204_v32 = vpop.permute.xlu1 %203  ;;  %v279_v33 = vpop.permute.xlu0 %278 }
 0x181   :  { %v206_v36 = vsel %vm36_vm0, %v204_v32, 0.0  ;;  %v281_v37 = vsel %vm36_vm0, %v279_v33, 0.0  ;;  %v799_v32 = vld [vmem:[%s1101_s2 + $0x18] sm:$0xff]  }
 0x182   :  { %207 = vadd.xlane.f32.xlu1 %v206_v36  ;;  %282 = vadd.xlane.f32.xlu0 %v281_v37 }
 0x184   :  { %v455_v40 = vpop.permute.xlu1 %454 }
 0x185   :  { %v457_v41 = vsel %vm351_vm1, %v455_v40, 0.0  ;;  %v801_v40 = vld [vmem:[%s1102_s3 + $0x8] sm:$0xff]  }
 0x186   :  { %38 = vadd.xlane.f32.xlu0 %v37_v38  ;;  %536 = vadd.xlane.f32.xlu1 %v535_v39  ;;  %v800_v38 = vld [vmem:[%s1102_s3] sm:$0xff]  }
 0x18a   :  { %458 = vadd.xlane.f32.xlu0 %v457_v41  ;;  %v802_v41 = vld [vmem:[%s1102_s3 + $0x10] sm:$0xff]  }
 0x1c3   :  { %v354_v42 = vpop.xlane.xlu1 %353 }
 0x1c4   :  { %v356_v43 = vmul.f32 0.015625, %v354_v42 }
 0x1c6   :  { %v938_v44 = vsub.f32 %v350_v28, %v356_v43  ;;  %v803_v43 = vld [vmem:[%s1102_s3 + $0x18] sm:$0xff]  }
 0x1c8   :  { %v358_v45 = vmul.f32 %v938_v44, %v938_v44 }
 0x1ca   :  { %v359_v46 = vsel %vm351_vm1, %v358_v45, 0.0  ;;  %v805_v45 = vld [vmem:[%s1102_s3 + $0x28] sm:$0xff]  }
 0x1cb   :  { %360 = vadd.xlane.f32.xlu0 %v359_v46  ;;  %v806_v46 = vld [vmem:[%s1102_s3 + $0x30] sm:$0xff]  }
 0x20b   :  { %v133_v50 = vpop.xlane.xlu0 %132 }
 0x20c   :  { %v134_v51 = vmul.f32 0.03125, %v133_v50 }
 0x20e   :  { %v135_v52 = vadd.f32 1e-05, %v134_v51 }
 0x20f   :  { %v283_v53 = vpop.xlane.xlu0 %282  ;;  %v208_v55 = vpop.xlane.xlu1 %207 }
 0x210   :  { %808 = vrsqrt.f32 %v135_v52  ;;  %v284_v54 = vmul.f32 0.03125, %v283_v53  ;;  %v209_v58 = vmul.f32 0.03125, %v208_v55  ;;  %v657_v55 = vld [vmem:[%s1103_s4] ss:$0 sm:$0xff] }
 0x212   :  { %v285_v59 = vadd.f32 1e-05, %v284_v54  ;;  %v210_v0 = vadd.f32 1e-05, %v209_v58 }
 0x213   :  { %v39_v56 = vpop.xlane.xlu0 %38  ;;  %v537_v15 = vpop.xlane.xlu1 %536 }
 0x214   :  { %v41_v57 = vmul.f32 0.03125, %v39_v56  ;;  %810 = vrsqrt.f32 %v285_v59  ;;  %v539_v16 = vmul.f32 0.0078125, %v537_v15 }
 0x216   :  { %v967_v60 = vsub.f32 %v35_v34, %v41_v57  ;;  %v981_v17 = vsub.f32 %v930_v35, %v539_v16 }
 0x217   :  { %v459_v61 = vpop.xlane.xlu0 %458 }
 0x218   :  { %v460_v62 = vmul.f32 0.015625, %v459_v61  ;;  %v43_v63 = vmul.f32 %v967_v60, %v967_v60  ;;  %v541_v18 = vmul.f32 %v981_v17, %v981_v17 }
 0x21a   :  { %v809_v1 = vpop.eup %808  ;;  %v461_v2 = vadd.f32 1e-05, %v460_v62  ;;  %v44_v3 = vsel %vm36_vm0, %v43_v63, 0.0  ;;  %v542_v19 = vsel %vm534_vm2, %v541_v18, 0.0 }
 0x21b   :  { %45 = vadd.xlane.f32.xlu1 %v44_v3  ;;  %v137_v4 = vmul.f32 %v809_v1, %v899_v14 }
 0x21c   :  { %812 = vrsqrt.f32 %v461_v2 }
 0x21d   :  { %814 = vrsqrt.f32 %v210_v0  ;;  %v138_v5 = vpack.c.bf16 %v137_v4, %v137_v4  ;;  %v664_v0 = vld [vmem:[%s1104_s5] ss:$0 sm:$0xff]  ;;  %s828_s5 = smov 48  }
 0x21e   :  { %v811_v6 = vpop.eup %810 }
 0x21f   :  { %140 = vrot.lane.b32.xlu0 %v138_v5, %s822_s13  ;;  %v287_v8 = vmul.f32 %v811_v6, %v903_v20 }
 0x221   :  { %v288_v12 = vpack.c.bf16 %v287_v8, %v287_v8 }
 0x226   :  { %v813_v7 = vpop.eup %812 }
 0x227   :  { %v815_v9 = vpop.eup %814  ;;  %v463_v10 = vmul.f32 %v813_v7, %v912_v26  ;;  %v796_v26 = vld [vmem:[%s1101_s2] sm:$0xff]  }
 0x228   :  { %v212_v13 = vmul.f32 %v815_v9, %v905_v21 }
 0x229   :  { %v464_v11 = vpack.c.bf16 %v463_v10, %v463_v10 }
 0x22a   :  { %v213_v14 = vpack.c.bf16 %v212_v13, %v212_v13 }
 0x22b   :  { %466 = vrot.lane.b32.xlu0 %v464_v11, %s823_s14 }
 0x22c   :  { %290 = vrot.lane.b32.xlu1 %v288_v12, %s824_s19 }
 0x230   :  { %215 = vrot.lane.b32.xlu1 %v213_v14, %s823_s14 }
 0x254   :  { %543 = vadd.xlane.f32.xlu1 %v542_v19 }
 0x258   :  { %v361_v20 = vpop.xlane.xlu0 %360 }
 0x259   :  { %v362_v22 = vmul.f32 0.015625, %v361_v20 }
 0x25b   :  { %v363_v23 = vadd.f32 1e-05, %v362_v22  ;;  %v671_v22 = vld [vmem:[%s1107_s6] ss:$0 sm:$0xff] }
 0x25d   :  { %816 = vrsqrt.f32 %v363_v23 }
 0x267   :  { %v817_v31 = vpop.eup %816 }
 0x268   :  { %v365_v34 = vmul.f32 %v817_v31, %v938_v44  ;;  %v804_v44 = vld [vmem:[%s1102_s3 + $0x20] sm:$0xff]  }
 0x26a   :  { %v366_v37 = vpack.c.bf16 %v365_v34, %v365_v34 }
 0x291   :  { %v141_v21 = vpop.permute.xlu0 %140 }
 0x292   :  { %724 = vmatmul.mubr.msk.bf16.vlgmr.msra.gmra.mrb[0].mxu1 %vm70_vm4, %v141_v21 }
 0x293   :  { %736 = vmatpush3.bf16.msra.mxu1 %v947_v48  ;;  %739 = vmatprep.mubr.msk.bf16.mxu1 %vm826_vm3, %v825_v47 }
 0x294   :  { %737 = vmatprep.subr.bf16.mxu1 %v825_v47 }
 0x297   :  { %738 = vmatpush3.bf16.msra.mxu1 %v958_v49 }
 0x298   :  { %743 = vmatprep.subr.bf16.mxu1 %v825_v47 }
 0x29d   :  { %v467_v42 = vpop.permute.xlu0 %466 }
 0x2a8   :  { %v46_v24 = vpop.xlane.xlu1 %45 }
 0x2a9   :  { %v47_v25 = vmul.f32 0.03125, %v46_v24 }
 0x2ab   :  { %v48_v27 = vadd.f32 1e-05, %v47_v25 }
 0x2ac   :  { %v291_v28 = vpop.permute.xlu1 %290 }
 0x2ad   :  { %818 = vrsqrt.f32 %v48_v27  ;;  %740 = vmatmul.mubr.msk.bf16.vlgmr.msra.gmra.mrb[4].mxu1 %vm70_vm4, %v291_v28 }
 0x2ae   :  { %744 = vmatpush3.bf16.msra.mxu1 %v796_v26  ;;  %751 = vmatprep.mubr.msk.bf16.mxu1 %vm826_vm3, %v825_v47 }
 0x2af   :  { %745 = vmatprep.subr.bf16.mxu1 %v825_v47 }
 0x2b0   :  { %v216_v39 = vpop.permute.xlu1 %215 }
 0x2b2   :  { %746 = vmatpush3.bf16.msra.mxu1 %v797_v29 }
 0x2b3   :  { %747 = vmatprep.subr.bf16.mxu1 %v825_v47 }
 0x2b6   :  { %748 = vmatpush3.bf16.msra.mxu1 %v798_v30 }
 0x2b7   :  { %v819_v33 = vpop.eup %818  ;;  %749 = vmatprep.subr.bf16.mxu1 %v825_v47 }
 0x2b8   :  { %v50_v35 = vmul.f32 %v819_v33, %v967_v60 }
 0x2ba   :  { %750 = vmatpush3.bf16.msra.mxu1 %v799_v32  ;;  %v51_v36 = vpack.c.bf16 %v50_v35, %v50_v35 }
 0x2bb   :  { %755 = vmatprep.subr.bf16.mxu1 %v825_v47 }
 0x2bc   :  { %716 = vmatmul.mubr.msk.bf16.vlgmr.msra.gmra.mrb[0].mxu0 %vm70_vm4, %v51_v36 }
 0x2bd   :  { %728 = vmatpush3.bf16.msra.mxu0 %v947_v48  ;;  %752 = vmatmul.mubr.msk.bf16.vlgmr.msra.gmra.mrb[8].mxu1 %vm397_vm5, %v366_v37  ;;  %v807_v48 = vld [vmem:[%s1102_s3 + $0x38] sm:$0xff]   ;;  %s827_s3 = smov 16  }
 0x2be   :  { %756 = vmatpush3.bf16.msra.mxu1 %v796_v26  ;;  %729 = vmatprep.subr.bf16.mxu0 %v825_v47 }
 0x2bf   :  { %757 = vmatprep.subr.bf16.mxu1 %v825_v47  ;;  %731 = vmatprep.mubr.msk.bf16.mxu0 %vm826_vm3, %v825_v47 }
 0x2c0   :  { %763 = vmatprep.mubr.msk.bf16.mxu1 %vm826_vm3, %v825_v47 }
 0x2c1   :  { %730 = vmatpush3.bf16.msra.mxu0 %v958_v49 }
 0x2c2   :  { %758 = vmatpush3.bf16.msra.mxu1 %v797_v29  ;;  %767 = vmatprep.subr.bf16.mxu0 %v825_v47 }
 0x2c3   :  { %759 = vmatprep.subr.bf16.mxu1 %v825_v47 }
 0x2c4   :  { %732 = vmatmul.mubr.msk.bf16.vlgmr.msra.gmra.mrb[4].mxu0 %vm70_vm4, %v216_v39 }
 0x2c5   :  { %768 = vmatpush3.bf16.msra.mxu0 %v800_v38  ;;  %783 = vmatprep.mubr.msk.bf16.mxu0 %vm826_vm3, %v825_v47 }
 0x2c6   :  { %760 = vmatpush3.bf16.msra.mxu1 %v798_v30  ;;  %769 = vmatprep.subr.bf16.mxu0 %v825_v47 }
 0x2c7   :  { %761 = vmatprep.subr.bf16.mxu1 %v825_v47 }
 0x2c9   :  { %770 = vmatpush3.bf16.msra.mxu0 %v801_v40 }
 0x2ca   :  { %762 = vmatpush3.bf16.msra.mxu1 %v799_v32  ;;  %771 = vmatprep.subr.bf16.mxu0 %v825_v47 }
 0x2cd   :  { %764 = vmatmul.mubr.msk.bf16.vlgmr.msra.gmra.mrb[12].mxu1 %vm397_vm5, %v467_v42  ;;  %772 = vmatpush3.bf16.msra.mxu0 %v802_v41 }
 0x2ce   :  { %773 = vmatprep.subr.bf16.mxu0 %v825_v47 }
 0x2d1   :  { %774 = vmatpush3.bf16.msra.mxu0 %v803_v43 }
 0x2d2   :  { %775 = vmatprep.subr.bf16.mxu0 %v825_v47 }
 0x2d5   :  { %776 = vmatpush3.bf16.msra.mxu0 %v804_v44 }
 0x2d6   :  { %777 = vmatprep.subr.bf16.mxu0 %v825_v47 }
 0x2d9   :  { %778 = vmatpush3.bf16.msra.mxu0 %v805_v45 }
 0x2da   :  { %779 = vmatprep.subr.bf16.mxu0 %v825_v47 }
 0x2dd   :  { %780 = vmatpush3.bf16.msra.mxu0 %v806_v46 }
 0x2de   :  { %781 = vmatprep.subr.bf16.mxu0 %v825_v47 }
 0x2e1   :  { %v544_v49 = vpop.xlane.xlu1 %543  ;;  %782 = vmatpush3.bf16.msra.mxu0 %v807_v48 }
 0x2e2   :  { %v545_v50 = vmul.f32 0.0078125, %v544_v49 }
 0x2e4   :  { %v546_v51 = vadd.f32 1e-05, %v545_v50 }
 0x2e6   :  { %820 = vrsqrt.f32 %v546_v51 }
 0x2f0   :  { %v821_v52 = vpop.eup %820 }
 0x2f1   :  { %v548_v53 = vmul.f32 %v821_v52, %v981_v17 }
 0x2f3   :  { %v549_v54 = vpack.c.bf16 %v548_v53, %v548_v53 }
 0x2f5   :  { %784 = vmatmul.mubr.bf16.vlgmr.msra.gmra.mrb[8].mxu0 %v549_v54 }
 0x365   :  { %v179_v56 = vpop.f32.mrb[0].mxu1 }
 0x366   :  { %v180_v57 = vadd.f32 %v657_v55, %v179_v56  ;;  %v725_v58 = vpop.f32.mrb[1].mxu1 }
 0x367   :  { %v182_v59 = vpop.f32.mrb[2].mxu1 }
 0x368   :  { %186 = vrot.lane.b32.xlu0 %v180_v57, %s827_s3  ;;  %v726_v47 = vpop.f32.mrb[3].mxu1 }
 0x380   :  { %v329_v60 = vpop.f32.mrb[4].mxu1 }
 0x381   :  { %v741_v61 = vpop.f32.mrb[5].mxu1  ;;  %v330_v16 = vadd.f32 %v657_v55, %v329_v60 }
 0x382   :  { %v332_v62 = vpop.f32.mrb[6].mxu1 }
 0x383   :  { %v742_v63 = vpop.f32.mrb[7].mxu1 }
 0x38f   :  { %v108_v1 = vpop.f32.mrb[0].mxu0 }
 0x390   :  { %v109_v2 = vadd.f32 %v657_v55, %v108_v1  ;;  %v435_v3 = vpop.f32.mrb[8].mxu1  ;;  %v717_v4 = vpop.f32.mrb[1].mxu0 }
 0x391   :  { %v436_v5 = vadd.f32 %v664_v0, %v435_v3  ;;  %v753_v6 = vpop.f32.mrb[9].mxu1  ;;  %v111_v7 = vpop.f32.mrb[2].mxu0 }
 0x392   :  { %115 = vst.msk [vmem:[%s1105_s7] sm:$0x3] %vm114_vm6, %v109_v2  ;;  %v438_v8 = vpop.f32.mrb[10].mxu1  ;;  %v718_v9 = vpop.f32.mrb[3].mxu0 }
 0x393   :  { %441 = vst.msk [vmem:[%s1106_s8] sm:$0x3] %vm114_vm6, %v436_v5  ;;  %v754_v10 = vpop.f32.mrb[11].mxu1 }
 0x397   :  { %v254_v11 = vpop.f32.mrb[4].mxu0 }
 0x398   :  { %v255_v12 = vadd.f32 %v657_v55, %v254_v11  ;;  %v733_v13 = vpop.f32.mrb[5].mxu0 }
 0x399   :  { %v257_v14 = vpop.f32.mrb[6].mxu0 }
 0x39a   :  { %v734_v15 = vpop.f32.mrb[7].mxu0  ;;  %261 = vrot.lane.b32.xlu0 %v255_v12, %s824_s19 }
 0x39e   :  { %336 = vrot.lane.b32.xlu0 %v330_v16, %s828_s5 }
 0x3a0   :  { %v505_v17 = vpop.f32.mrb[12].mxu1 }
 0x3a1   :  { %v506_v18 = vadd.f32 %v664_v0, %v505_v17  ;;  %v765_v19 = vpop.f32.mrb[13].mxu1 }
 0x3a2   :  { %v508_v20 = vpop.f32.mrb[14].mxu1 }
 0x3a3   :  { %512 = vrot.lane.b32.xlu0 %v506_v18, %s827_s3  ;;  %v766_v21 = vpop.f32.mrb[15].mxu1 }
 0x3c8   :  { %v638_v23 = vpop.f32.mrb[8].mxu0 }
 0x3c9   :  { %v639_v24 = vadd.f32 %v671_v22, %v638_v23  ;;  %v785_v25 = vpop.f32.mrb[9].mxu0 }
 0x3ca   :  { %v641_v26 = vpop.f32.mrb[10].mxu0 }
 0x3cb   :  { %644 = vst.msk [vmem:[%s1108_s9] sm:$0x3] %vm114_vm6, %v639_v24  ;;  %v786_v27 = vpop.f32.mrb[11].mxu0 }
 0x3da   :  { %v187_v28 = vpop.permute.xlu0 %186 }
 0x3db   :  { %190 = vst.msk [vmem:[%s1105_s7] sm:$0x3] %vm189_vm7, %v187_v28 }
 0x40c   :  { %v262_v29 = vpop.permute.xlu0 %261 }
 0x40d   :  { %265 = vst.msk [vmem:[%s1105_s7] sm:$0x3] %vm264_vm8, %v262_v29 }
 0x410   :  { %v337_v30 = vpop.permute.xlu0 %336 }
 0x411   :  { %340 = vst.msk [vmem:[%s1105_s7] sm:$0x3] %vm339_vm9, %v337_v30 }
 0x415   :  { %v513_v31 = vpop.permute.xlu0 %512 }
 0x416   :  { %515 = vst.msk [vmem:[%s1106_s8] sm:$0x3] %vm189_vm7, %v513_v31 }

</bundles_post_ra>
